<compile_context>
chip_gen: v7x
topology: tpu7x:2x2x1
jax: 0.10.0
libtpu: 0.0.40
codegen_flags: <defaults>
</compile_context>

<pallas_src>
import functools

import jax
import jax.numpy as jnp
from jax.experimental import pallas as pl
from jax.experimental.pallas import tpu as pltpu


def _round_up(n: int, m: int) -> int:
    return ((n + m - 1) // m) * m


def lowrank_kernel(x_ref, u_ref, v_ref, b_ref, o_ref, *, precise_h: bool):
    # Cast activations to the weight dtype on the VPU (in VMEM): x crosses HBM once,
    # in its original dtype, instead of being re-materialized as bf16 by the wrapper.
    x = x_ref[...].astype(u_ref.dtype)
    # U: (TB, K) @ (K, R) -> (TB, R), f32 accumulation on the MXU (no bias, no act).
    h = jnp.dot(x, u_ref[...], preferred_element_type=jnp.float32)
    if precise_h:
        # Accuracy mode: keep h in f32 for the second contraction. The extra MXU
        # passes are hidden under the HBM-bound roofline.
        out = jnp.dot(h, v_ref[...].astype(jnp.float32),
                      preferred_element_type=jnp.float32)
    else:
        # Fast mode: re-narrow h so the second matmul runs at native bf16 MXU rate.
        out = jnp.dot(h.astype(v_ref.dtype), v_ref[...],
                      preferred_element_type=jnp.float32)
    # Bias add on the VPU in f32, then narrow (or not) to the requested output dtype.
    o_ref[...] = (out + b_ref[...]).astype(o_ref.dtype)


def prepare_lowrank_params(u_w, v_w, v_b, *, weight_dtype=jnp.bfloat16):
    """One-time parameter prep (call at init, reuse the result every forward).

    u_w: (in_features, rank)  == U.weight.T (bias=False)
    v_w: (rank, out_features) == V.weight.T
    v_b: (out_features,)      == V.bias
    Casts weights to the MXU dtype once (guarded so already-prepared weights pass
    through untouched) and reshapes the bias to (1, N) in f32. No padding is done,
    so re-preparing never changes shapes.
    """
    u_p = u_w if u_w.dtype == weight_dtype else u_w.astype(weight_dtype)
    v_p = v_w if v_w.dtype == weight_dtype else v_w.astype(weight_dtype)
    b_p = v_b.astype(jnp.float32).reshape(1, -1)
    return u_p, v_p, b_p


def _choose_batch_tile(B: int, block_b: int) -> int:
    # Aim for >= 2 grid steps (so "parallel" can use both v7x TensorCores), keep the
    # tile sublane-aligned (multiple of 8), and cap it at block_b for v5e/v6e fat-tile
    # pipelining. Tiny batches collapse to a single full-dim block.
    tb = _round_up(max(pl.cdiv(B, 2), 8), 8)
    tb = min(tb, block_b)
    if tb >= B:
        return B            # single grid step, full-dim batch block (always legal)
    return tb


def lowrank_linear_forward(x, u_p, v_p, b_p, *, block_b=512, precise_h=True,
                           out_dtype=None):
    """LowRankLinear forward: V(U(x)) = (x @ u_p) @ v_p + b_p.

    x:   (B, in_features)            — any float dtype; cast to weight dtype in-kernel
    u_p: (in_features, rank)         — prepared (e.g. bf16) U weight
    v_p: (rank, out_features)        — prepared (e.g. bf16) V weight
    b_p: (1, out_features) f32       — prepared V bias
    Returns (B, out_features) in out_dtype (defaults to x.dtype).
    """
    B, K = x.shape
    Ku, R = u_p.shape
    Rv, N = v_p.shape
    assert K == Ku and R == Rv and b_p.shape == (1, N)
    out_dtype = x.dtype if out_dtype is None else jnp.dtype(out_dtype)

    TB = _choose_batch_tile(B, block_b)
    grid = (pl.cdiv(B, TB),)

    x_bytes = jnp.dtype(x.dtype).itemsize
    w_bytes = jnp.dtype(u_p.dtype).itemsize
    o_bytes = jnp.dtype(out_dtype).itemsize

    cost = pl.CostEstimate(
        flops=2 * B * K * R + 2 * B * R * N,
        transcendentals=0,
        bytes_accessed=B * K * x_bytes + (K * R + R * N) * w_bytes
        + N * 4 + B * N * o_bytes,
    )

    # Rough VMEM footprint: double-buffered x/out tiles, single-buffered weights+bias,
    # plus f32 intermediates. Only raise the scoped-VMEM ceiling when it matters
    # (v5e defaults to 16 MiB); stay well under v7x's 64 MiB physical VMEM.
    vmem_est = (2 * TB * K * x_bytes
                + (K * R + R * N) * w_bytes + N * 4
                + 2 * TB * N * o_bytes
                + TB * (R + N) * 4)
    compiler_kwargs = dict(dimension_semantics=("parallel",))
    if vmem_est > 12 * 1024 * 1024:
        compiler_kwargs["vmem_limit_bytes"] = min(int(vmem_est * 2), 60 * 1024 * 1024)

    kernel = functools.partial(lowrank_kernel, precise_h=precise_h)

    out = pl.pallas_call(
        kernel,
        out_shape=jax.ShapeDtypeStruct((B, N), out_dtype),
        grid_spec=pl.GridSpec(
            grid=grid,
            in_specs=[
                # x: tiled over batch only; full-K block (no padding, no pre-cast).
                pl.BlockSpec((TB, K), lambda i: (i, 0)),
                # Weights/bias: constant index -> fetched once; single-buffered.
                pl.BlockSpec((K, R), lambda i: (0, 0),
                             pipeline_mode=pl.Buffered(buffer_count=1)),
                pl.BlockSpec((R, N), lambda i: (0, 0),
                             pipeline_mode=pl.Buffered(buffer_count=1)),
                pl.BlockSpec((1, N), lambda i: (0, 0),
                             pipeline_mode=pl.Buffered(buffer_count=1)),
            ],
            out_specs=pl.BlockSpec((TB, N), lambda i: (i, 0)),
        ),
        compiler_params=pltpu.CompilerParams(**compiler_kwargs),
        cost_estimate=cost,
    )(x, u_p, v_p, b_p)

    return out


def init_params(key, in_features=784, rank=64, out_features=256):
    """Deterministic init mimicking nn.Linear defaults (uniform ±1/sqrt(fan_in))."""
    k1, k2, k3 = jax.random.split(key, 3)
    bound_u = 1.0 / jnp.sqrt(in_features)
    bound_v = 1.0 / jnp.sqrt(rank)
    u_w = jax.random.uniform(k1, (in_features, rank), jnp.float32, -bound_u, bound_u)
    v_w = jax.random.uniform(k2, (rank, out_features), jnp.float32, -bound_v, bound_v)
    v_b = jax.random.uniform(k3, (out_features,), jnp.float32, -bound_v, bound_v)
    return u_w, v_w, v_b


if __name__ == "__main__":
    key = jax.random.PRNGKey(0)
    kx, kp = jax.random.split(key)

    batch_size, in_features, rank, out_features = 32, 784, 64, 256
    x = jax.random.normal(kx, (batch_size, in_features), jnp.float32)
    u_w, v_w, v_b = init_params(kp, in_features, rank, out_features)

    # One-time weight preparation (bf16 cast); reused across every forward call.
    u_p, v_p, b_p = prepare_lowrank_params(u_w, v_w, v_b)

    out = lowrank_linear_forward(x, u_p, v_p, b_p)
    out = jax.block_until_ready(out)

    # Pure-JAX f32 reference; tolerance loosened for bf16 MXU inputs (f32 accumulation).
    ref = (x @ u_w) @ v_w + v_b
    assert out.shape == (batch_size, out_features)
    assert out.dtype == jnp.float32
    assert jnp.allclose(out, ref, atol=3e-2, rtol=3e-2)

    print("KERNEL_OK")
</pallas_src>

<mosaic_0001>
module attributes {stable_mosaic.version = 11 : i64} {
  func.func @lowrank_kernel(%arg0: i32, %arg1: memref<16x784xf32, #tpu.memory_space<vmem>>, %arg2: memref<784x64xbf16, #tpu.memory_space<vmem>>, %arg3: memref<64x256xbf16, #tpu.memory_space<vmem>>, %arg4: memref<1x256xf32, #tpu.memory_space<vmem>>, %arg5: memref<16x256xf32, #tpu.memory_space<vmem>>) attributes {dimension_semantics = [#tpu.dimension_semantics<parallel>], iteration_bounds = array<i64: 2>, scalar_prefetch = 0 : i64, scratch_operands = 0 : i64, tpu.core_type = #tpu.core_type<tc>, window_params = [{transform_indices = @transform_0, window_bounds = array<i64: 16, 784>}, {pipeline_mode = #tpu.pipeline_mode<synchronous>, transform_indices = @transform_1, window_bounds = array<i64: 784, 64>}, {pipeline_mode = #tpu.pipeline_mode<synchronous>, transform_indices = @transform_2, window_bounds = array<i64: 64, 256>}, {pipeline_mode = #tpu.pipeline_mode<synchronous>, transform_indices = @transform_3, window_bounds = array<i64: 1, 256>}, {transform_indices = @transform_4, window_bounds = array<i64: 16, 256>}]} {
    %c0 = arith.constant 0 : index
    %c0_0 = arith.constant 0 : index
    %0 = vector.load %arg1[%c0, %c0_0] : memref<16x784xf32, #tpu.memory_space<vmem>>, vector<16x784xf32>
    %1 = arith.truncf %0 : vector<16x784xf32> to vector<16x784xbf16>
    %c0_1 = arith.constant 0 : index
    %c0_2 = arith.constant 0 : index
    %2 = vector.load %arg2[%c0_1, %c0_2] : memref<784x64xbf16, #tpu.memory_space<vmem>>, vector<784x64xbf16>
    %cst = arith.constant dense<0.000000e+00> : vector<16x64xf32>
    %3 = tpu.matmul %1, %2, %cst {dimension_numbers = #tpu.dot_dimension_numbers<[1], [0], [0], [1], [0, 0, 1, 1], [], []>} : vector<16x784xbf16>, vector<784x64xbf16>, vector<16x64xf32> -> vector<16x64xf32>
    %c0_3 = arith.constant 0 : index
    %c0_4 = arith.constant 0 : index
    %4 = vector.load %arg3[%c0_3, %c0_4] : memref<64x256xbf16, #tpu.memory_space<vmem>>, vector<64x256xbf16>
    %5 = arith.extf %4 : vector<64x256xbf16> to vector<64x256xf32>
    %cst_5 = arith.constant dense<0.000000e+00> : vector<16x256xf32>
    %6 = tpu.matmul %3, %5, %cst_5 {dimension_numbers = #tpu.dot_dimension_numbers<[1], [0], [0], [1], [0, 0, 1, 1], [], []>} : vector<16x64xf32>, vector<64x256xf32>, vector<16x256xf32> -> vector<16x256xf32>
    %c0_6 = arith.constant 0 : index
    %c0_7 = arith.constant 0 : index
    %7 = vector.load %arg4[%c0_6, %c0_7] : memref<1x256xf32, #tpu.memory_space<vmem>>, vector<1x256xf32>
    %8 = vector.broadcast %7 : vector<1x256xf32> to vector<16x256xf32>
    %9 = arith.addf %6, %8 : vector<16x256xf32>
    %c0_8 = arith.constant 0 : index
    %c0_9 = arith.constant 0 : index
    %10 = vector.load %arg5[%c0_8, %c0_9] : memref<16x256xf32, #tpu.memory_space<vmem>>, vector<16x256xf32>
    tpu.vector_store %arg5[%c0_8, %c0_9], %9 {strides = array<i32>} : memref<16x256xf32, #tpu.memory_space<vmem>>, vector<16x256xf32>,
    return
  }
  func.func @transform_0(%arg0: i32) -> (i32, i32) {
    %c0_i32 = arith.constant 0 : i32
    %c0_i32_0 = arith.constant 0 : i32
    return %arg0, %c0_i32 : i32, i32
  }
  func.func @transform_1(%arg0: i32) -> (i32, i32) {
    %c0_i32 = arith.constant 0 : i32
    %c0_i32_0 = arith.constant 0 : i32
    %c0_i32_1 = arith.constant 0 : i32
    return %c0_i32, %c0_i32_0 : i32, i32
  }
  func.func @transform_2(%arg0: i32) -> (i32, i32) {
    %c0_i32 = arith.constant 0 : i32
    %c0_i32_0 = arith.constant 0 : i32
    %c0_i32_1 = arith.constant 0 : i32
    return %c0_i32, %c0_i32_0 : i32, i32
  }
  func.func @transform_3(%arg0: i32) -> (i32, i32) {
    %c0_i32 = arith.constant 0 : i32
    %c0_i32_0 = arith.constant 0 : i32
    %c0_i32_1 = arith.constant 0 : i32
    return %c0_i32, %c0_i32_0 : i32, i32
  }
  func.func @transform_4(%arg0: i32) -> (i32, i32) {
    %c0_i32 = arith.constant 0 : i32
    %c0_i32_0 = arith.constant 0 : i32
    return %arg0, %c0_i32 : i32, i32
  }
}

</mosaic_0001>

<bundles_post_ra>
// kernel: tpu_custom_call.1
= control target key start
LH: loop header
LB: loop body
LE: loop exit
PB: predicated region body
PF: predicated region fallthrough
CT: control target
= control target key end

     0   :  { %9 = vsyncpa [#allocation3], 0  ;;  %s1645_s0 = inlined_call_operand.vmem [shape: f32[32,784], index: 0, kind: input, shape index: {}]   ;;  %s1646_s1 = inlined_call_operand.vmem [shape: bf16[784,64], index: 1, kind: input, shape index: {}]   ;;  %s1647_s2 = inlined_call_operand.vmem [shape: bf16[64,256], index: 2, kind: input, shape index: {}]   ;;  %s1648_s3 = inlined_call_operand.vmem [shape: f32[1,256], index: 3, kind: input, shape index: {}]   ;;  %s1649_s4 = inlined_call_operand.hbm [shape: f32[32,256], index: 4, kind: output, shape index: {}]  }
   0x1   :  { %11 = vsyncpa [#allocation3 + $0x1], 0  ;;  %s1349_s15 = smov 0   ;;  %s1351_s16 = smov 0  }
   0x2   :  { %s1353_s17 = smov 0   ;;  %s1355_s18 = smov 0  }
   0x3 LB: > { %s1370_s19 = sadd.s32 4294967295, %s1317_s18   ;;  %s985_s20 = sadd.s32 4294967294, %s1317_s18   ;;  %s1317_s18 = sphi %s1355_s18, %s1655_s18   ;;  %s1313_s17 = sphi %s1353_s17, %s1654_s17   ;;  %s1309_s16 = sphi %s1351_s16, %s1653_s16   ;;  %s1305_s15 = sphi %s1349_s15, %s1652_s15  }
   0x4   : > { %s1374_s21 = sadd.s32 1, %s1317_s18   ;;  %s113_s22 = sadd.s32 1, %s1313_s17 }
   0x5   : > { %s110_s23 = ssub.s32 %s1317_s18, %s1374_s21  ;;  %p123_p0 = scmp.ne.s32.totalorder %s1313_s17, %s1309_s16 }
   0x6   : > { %p111_p1 = scmp.eq.s32.totalorder %s110_s23, 0  ;;  %p124_p2 = scmp.eq.s32.totalorder %s1370_s19, 1 }
   0x7   : > { %p129_p3 = scmp.ne.s32.totalorder %s1309_s16, %s1305_s15  ;;  %p130_p4 = scmp.eq.s32.totalorder %s985_s20, 1 }
   0x8   : > { %s1385_s24 = scalar_select %p111_p1, %s1313_s17, %s113_s22  }
   0x9   : > { %p1387_p5 = por %p124_p2, %p123_p0  ;;  %p1391_p6 = por %p130_p4, %p129_p3 }
   0xa   : > { %p988_p7 = scmp.ge.s32.totalorder %s1317_s18, 1  ;;  %p167_p8 = scmp.lt.s32.totalorder %s1317_s18, 3 }
   0xc   : > { %p168_p9 = pnand %p988_p7, %p167_p8 }
   0xd   : > { %v1194_v0 = vld [vmem:[%s1646_s1 + $0x40] sm:$0xff] (!%p168_p9)   ;;  %v1198_v4 = vld [vmem:[%s1646_s1 + $0x48] sm:$0xff] (!%p168_p9)   ;;  %v1202_v8 = vld [vmem:[%s1646_s1 + $0x50] sm:$0xff] (!%p168_p9)   ;;  %s990_s14 = sshll.u32 (!%p168_p9), %s1370_s19, 1  ;;  %v1319_v43 = vmov (!%p168_p9), 0.0   ;;  %vm1320_vm0 = vmmov (!%p168_p9), 0  }
   0xe   : > { %171 = sbr.rel (%p168_p9) target bundleno = 532 (0x214), region = 36  ;;  %v1195_v1 = vld [vmem:[%s1646_s1 + $0xc0] sm:$0xff] (!%p168_p9)   ;;  %1052 = vmatprep.subr.bf16.mxu0 (!%p168_p9), %v1194_v0  ;;  %v1199_v5 = vld [vmem:[%s1646_s1 + $0xc8] sm:$0xff] (!%p168_p9)   ;;  %v1203_v9 = vld [vmem:[%s1646_s1 + $0xd0] sm:$0xff] (!%p168_p9)   ;;  %p195_p10 = scmp.lt.s32.totalorder (!%p168_p9), %s990_s14, 3  ;;  %vm616_vm1 = vcmask (!%p168_p9), 130048  }
   0xf   : > { %v1196_v2 = vld [vmem:[%s1646_s1] sm:$0xff] (!%p168_p9)   ;;  %1074 = vmatprep.subr.bf16.mxu1 (!%p168_p9), %v1195_v1  ;;  %v1200_v6 = vld [vmem:[%s1646_s1 + $0x8] sm:$0xff] (!%p168_p9)   ;;  %v1204_v10 = vld [vmem:[%s1646_s1 + $0x10] sm:$0xff] (!%p168_p9)   ;;  %vm820_vm2 = vcmask (!%p168_p9), 523264   ;;  %s1051_s10 = sshll.u32 (!%p168_p9), %s1370_s19, 9  ;;  %s1321_s13 = smov (!%p168_p9), [#allocation2]  }
  0x10   : > { %v1197_v3 = vld [vmem:[%s1646_s1 + $0x80] sm:$0xff] (!%p168_p9)   ;;  %1053 = vmatpush3.bf16.msra.mxu0 (!%p168_p9), %v1196_v2  ;;  %v1201_v7 = vld [vmem:[%s1646_s1 + $0x88] sm:$0xff] (!%p168_p9)   ;;  %v1205_v11 = vld [vmem:[%s1646_s1 + $0x90] sm:$0xff] (!%p168_p9)   ;;  %s1602_s12 = scalar_lea.hbm (!%p168_p9), %s1649_s4, %s1051_s10  ;;  %s1259_s22 = sshll.u32 (!%p168_p9), %s1321_s13, 4  ;;  %s1260_s22 = int_to_ptr.vmem [resolvable:$false] %s1259_s22 }
  0x11   : > { %1075 = vmatpush3.bf16.msra.mxu1 (!%p168_p9), %v1197_v3  ;;  %1054 = vmatprep.subr.bf16.mxu0 (!%p168_p9), %v1198_v4  ;;  %v1206_v12 = vld [vmem:[%s1646_s1 + $0x58] sm:$0xff] (!%p168_p9)   ;;  %v1210_v16 = vld [vmem:[%s1646_s1 + $0x60] sm:$0xff] (!%p168_p9)   ;;  %v1214_v20 = vld [vmem:[%s1646_s1 + $0x68] sm:$0xff] (!%p168_p9)   ;;  %s1261_s23 = scalar_lea.vmem (!%p168_p9), %s1260_s22, 1024 }
  0x12   : > { %1076 = vmatprep.subr.bf16.mxu1 (!%p168_p9), %v1199_v5  ;;  %v1207_v13 = vld [vmem:[%s1646_s1 + $0xd8] sm:$0xff] (!%p168_p9)   ;;  %v1211_v17 = vld [vmem:[%s1646_s1 + $0xe0] sm:$0xff] (!%p168_p9)   ;;  %v1215_v21 = vld [vmem:[%s1646_s1 + $0xe8] sm:$0xff] (!%p168_p9)  }
  0x13   : > { %v1208_v14 = vld [vmem:[%s1646_s1 + $0x18] sm:$0xff] (!%p168_p9)   ;;  %v1212_v18 = vld [vmem:[%s1646_s1 + $0x20] sm:$0xff] (!%p168_p9)   ;;  %v1216_v22 = vld [vmem:[%s1646_s1 + $0x28] sm:$0xff] (!%p168_p9)  }
  0x14   : > { %1055 = vmatpush3.bf16.msra.mxu0 (!%p168_p9), %v1200_v6  ;;  %v1209_v15 = vld [vmem:[%s1646_s1 + $0x98] sm:$0xff] (!%p168_p9)   ;;  %v1213_v19 = vld [vmem:[%s1646_s1 + $0xa0] sm:$0xff] (!%p168_p9)   ;;  %v1217_v23 = vld [vmem:[%s1646_s1 + $0xa8] sm:$0xff] (!%p168_p9)  }
  0x15   : > { %1077 = vmatpush3.bf16.msra.mxu1 %v1201_v7  ;;  %1056 = vmatprep.subr.bf16.mxu0 %v1202_v8  ;;  %s1657_s14 = smov (!%p195_p10, %s990_s14), 3  ;;  %v1218_v24 = vld [vmem:[%s1646_s1 + $0x70] sm:$0xff]   ;;  %v1222_v28 = vld [vmem:[%s1646_s1 + $0x78] sm:$0xff]   ;;  %v1226_v45 = vld [vmem:[%s1646_s1 + $0x140] sm:$0xff]  }
  0x16   : > { %1078 = vmatprep.subr.bf16.mxu1 %v1203_v9  ;;  %v1219_v25 = vld [vmem:[%s1646_s1 + $0xf0] sm:$0xff]   ;;  %s1150_s30 = smul.u32 56, %s1657_s14  ;;  %v1223_v29 = vld [vmem:[%s1646_s1 + $0xf8] sm:$0xff]   ;;  %v1227_v46 = vld [vmem:[%s1646_s1 + $0x100] sm:$0xff]  }
  0x17   : > { %v1220_v26 = vld [vmem:[%s1646_s1 + $0x30] sm:$0xff]   ;;  %v1224_v30 = vld [vmem:[%s1646_s1 + $0x38] sm:$0xff]   ;;  %v1228_v47 = vld [vmem:[%s1646_s1 + $0x148] sm:$0xff]  }
  0x18   : > { %1057 = vmatpush3.bf16.msra.mxu0 %v1204_v10  ;;  %v1221_v27 = vld [vmem:[%s1646_s1 + $0xb0] sm:$0xff]   ;;  %s1491_s20 = scalar_lea.vmem %s1645_s0, %s1150_s30  ;;  %v1225_v31 = vld [vmem:[%s1646_s1 + $0xb8] sm:$0xff]   ;;  %v1229_v48 = vld [vmem:[%s1646_s1 + $0x108] sm:$0xff]   ;;  %s191_s30 = sand.u32 1, %s1309_s16  }
  0x19   : > { %1079 = vmatpush3.bf16.msra.mxu1 %v1205_v11  ;;  %1058 = vmatprep.subr.bf16.mxu0 %v1206_v12  ;;  %v204_v32 = vld [vmem:[%s1491_s20 + $0x8] sm:$0xff]  ;;  %v211_v33 = vld [vmem:[%s1491_s20 + $0x40] sm:$0xff]  ;;  %v206_v34 = vld [vmem:[%s1491_s20 + $0x18] sm:$0xff]  ;;  %s989_s7 = sshll.u32 %s191_s30, 5  ;;  %s1604_s14 = scalar_lea.sflag [#allocation3], %s191_s30 }
  0x1a   : > { %1080 = vmatprep.subr.bf16.mxu1 %v1207_v13  ;;  %v218_v35 = vpack.c.bf16 %v211_v33, %v204_v32  ;;  %v213_v36 = vld [vmem:[%s1491_s20 + $0x50] sm:$0xff]  ;;  %v203_v37 = vld [vmem:[%s1491_s20] sm:$0xff]  ;;  %v210_v38 = vld [vmem:[%s1491_s20 + $0x38] sm:$0xff]  ;;  %s193_s8 = scalar_lea.vmem [#allocation2], %s989_s7 }
  0x1b   : > { %v220_v39 = vpack.c.bf16 %v213_v36, %v206_v34  ;;  %v217_v40 = vpack.c.bf16 %v210_v38, %v203_v37  ;;  %v205_v41 = vld [vmem:[%s1491_s20 + $0x10] sm:$0xff]  ;;  %v212_v42 = vld [vmem:[%s1491_s20 + $0x48] sm:$0xff]  ;;  %v1232_v51 = vld [vmem:[%s1646_s1 + $0x158] sm:$0xff]   ;;  %s923_s9 = sshll.u32 %s193_s8, 4  ;;  %s1597_s9 = int_to_ptr.vmem [resolvable:$true] %s923_s9 }
  0x1c   : > { %1059 = vmatpush3.bf16.msra.mxu0 %v1208_v14  ;;  %652 = vmatprep.mubr.bf16.mxu0 %v218_v35  ;;  %v219_v44 = vpack.c.bf16 %v212_v42, %v205_v41  ;;  %v1230_v49 = vld [vmem:[%s1646_s1 + $0x150] sm:$0xff]   ;;  %v1233_v52 = vld [vmem:[%s1646_s1 + $0x118] sm:$0xff]   ;;  %v1234_v53 = vld [vmem:[%s1646_s1 + $0x160] sm:$0xff]   ;;  %s1255_s19 = scalar_lea.vmem %s1597_s9, 512  ;;  %p1262_p0 = scmp.lt.s32.totalorder %s1597_s9, %s1260_s22 }
  0x1d   : > { %1081 = vmatpush3.bf16.msra.mxu1 %v1209_v15  ;;  %1060 = vmatprep.subr.bf16.mxu0 %v1210_v16  ;;  %v1231_v50 = vld [vmem:[%s1646_s1 + $0x110] sm:$0xff]   ;;  %v1235_v54 = vld [vmem:[%s1646_s1 + $0x120] sm:$0xff]   ;;  %v1236_v55 = vld [vmem:[%s1646_s1 + $0x168] sm:$0xff]   ;;  %p1256_p11 = scmp.ne.s32.totalorder %s1597_s9, %s1255_s19  ;;  %p1263_p1 = scmp.lt.s32.totalorder %s1261_s23, %s1255_s19 }
  0x1e   : > { %1082 = vmatprep.subr.bf16.mxu1 %v1211_v17  ;;  %693 = vmatprep.mubr.bf16.mxu1 %v220_v39  ;;  %v1242_v56 = vld [vmem:[%s1646_s1 + $0x180] sm:$0xff]   ;;  %v208_v57 = vld [vmem:[%s1491_s20 + $0x28] sm:$0xff]  ;;  %v1238_v60 = vld [vmem:[%s1646_s1 + $0x170] sm:$0xff]  }
  0x1f   : > { %v1237_v58 = vld [vmem:[%s1646_s1 + $0x128] sm:$0xff]   ;;  %v215_v59 = vld [vmem:[%s1491_s20 + $0x60] sm:$0xff]  ;;  %v209_v62 = vld [vmem:[%s1491_s20 + $0x30] sm:$0xff]  ;;  %p1257_p12 = pnand %p1256_p11, %p1387_p5  ;;  %p1264_p2 = por %p1263_p1, %p1262_p0 }
  0x20   : > { %1061 = vmatpush3.bf16.msra.mxu0 %v1212_v18  ;;  %v222_v61 = vpack.c.bf16 %v215_v59, %v208_v57  ;;  %v216_v63 = vld [vmem:[%s1491_s20 + $0x68] sm:$0xff]  ;;  %v1239_v1 = vld [vmem:[%s1646_s1 + $0x130] sm:$0xff]   ;;  %v1240_v2 = vld [vmem:[%s1646_s1 + $0x178] sm:$0xff]  }
  0x21   : > { %1083 = vmatpush3.bf16.msra.mxu1 %v1213_v19  ;;  %1062 = vmatprep.subr.bf16.mxu0 %v1214_v20  ;;  %v223_v0 = vpack.c.bf16 %v216_v63, %v209_v62  ;;  %v1241_v3 = vld [vmem:[%s1646_s1 + $0x138] sm:$0xff]   ;;  %v207_v4 = vld [vmem:[%s1491_s20 + $0x20] sm:$0xff]  ;;  %p1258_p13 = pneg %p1257_p12 }
  0x22   : > { %1084 = vmatprep.subr.bf16.mxu1 %v1215_v21  ;;  %v214_v5 = vld [vmem:[%s1491_s20 + $0x58] sm:$0xff]  ;;  %v1243_v7 = vld [vmem:[%s1647_s2 + $0x4] ss:$8 sps:$4 sm:$0xff]   ;;  %v1245_v8 = vld [vmem:[%s1647_s2] ss:$8 sps:$4 sm:$0xff]  }
  0x23   : > { %v221_v6 = vpack.c.bf16 %v214_v5, %v207_v4  ;;  %v1246_v9 = vld [vmem:[%s1647_s2 + $0x14] ss:$8 sps:$4 sm:$0xff]   ;;  %v1248_v10 = vld [vmem:[%s1647_s2 + $0x10] ss:$8 sps:$4 sm:$0xff]   ;;  %v1249_v11 = vld [vmem:[%s1647_s2 + $0x24] ss:$8 sps:$4 sm:$0xff]   ;;  %p1265_p3 = pnand %p1264_p2, %p1258_p13 }
  0x24   : > { %1063 = vmatpush3.bf16.msra.mxu0 %v1216_v22  ;;  %v1251_v12 = vld [vmem:[%s1647_s2 + $0x20] ss:$8 sps:$4 sm:$0xff]   ;;  %v1252_v13 = vld [vmem:[%s1647_s2 + $0x34] ss:$8 sps:$4 sm:$0xff]   ;;  %v1254_v14 = vld [vmem:[%s1647_s2 + $0x30] ss:$8 sps:$4 sm:$0xff]  }
  0x25   : > { %1085 = vmatpush3.bf16.msra.mxu1 %v1217_v23  ;;  %1064 = vmatprep.subr.bf16.mxu0 %v1218_v24 }
  0x26   : > { %1086 = vmatprep.subr.bf16.mxu1 %v1219_v25 }
  0x28   : > { %1065 = vmatpush3.bf16.msra.mxu0 %v1220_v26 }
  0x29   : > { %1087 = vmatpush3.bf16.msra.mxu1 %v1221_v27  ;;  %1066 = vmatprep.subr.bf16.mxu0 %v1222_v28 }
  0x2a   : > { %1088 = vmatprep.subr.bf16.mxu1 %v1223_v29 }
  0x2c   : > { %1067 = vmatpush3.bf16.msra.mxu0 %v1224_v30 }
  0x2d   : > { %1089 = vmatpush3.bf16.msra.mxu1 %v1225_v31  ;;  %1096 = vmatprep.subr.bf16.mxu0 %v1226_v45 }
  0x2e   : > { %1120 = vmatprep.subr.bf16.mxu1 %v1319_v43 }
  0x2f   : > { %653 = vmatmul.mubr.bf16.vlgmr.msra.gmra.mrb[0].mxu0 %v217_v40 }
  0x30   : > { %694 = vmatmul.mubr.bf16.vlgmr.msra.gmra.mrb[0].mxu1 %v219_v44  ;;  %1097 = vmatpush3.bf16.msra.mxu0 %v1227_v46  ;;  %v810_v44 = vlaneseq }
  0x31   : > { %1122 = vmatprep.mubr.msk.bf16.mxu1 %vm1320_vm0, %v1319_v43  ;;  %1098 = vmatprep.subr.bf16.mxu0 %v1228_v47  ;;  %v808_v47 = vld [vmem:[%s1648_s3] sm:$0x3] }
  0x32   : > { %1121 = vmatpush3.bf16.msra.mxu1 %v1242_v56  ;;  %734 = vmatprep.mubr.bf16.mxu0 %v222_v61  ;;  %v811_v45 = vshrl.u32 %v810_v44, 7 }
  0x33   : > { %1127 = vmatprep.subr.bf16.mxu1 %v1243_v7 }
  0x34   : > { %1099 = vmatpush3.bf16.msra.mxu0 %v1229_v48  ;;  %v812_v46 = vsub.s32 0, %v811_v45  ;;  %v816_v48 = vsub.s32 1, %v811_v45 }
  0x35   : > { %1100 = vmatprep.subr.bf16.mxu0 %v1230_v49 }
  0x36   : > { %v813_v49 = vrot.slane %v808_v47, %v812_v46 }
  0x38   : > { %1101 = vmatpush3.bf16.msra.mxu0 %v1231_v50  ;;  %1123 = vmatmul.mubr.msk.bf16.vlgmr.msra.gmra.mrb[4].mxu1 %vm616_vm1, %v223_v0  ;;  %v817_v50 = vrot.slane %v808_v47, %v816_v48 }
  0x39   : > { %1102 = vmatprep.subr.bf16.mxu0 %v1232_v51  ;;  %891 = vmatprep.mubr.f32.mxu1 %v1319_v43 }
  0x3a   : > { %1129 = vmatpush1.bf16.msra.mxu1 %v1245_v8 }
  0x3b   : > { %1131 = vmatprep.subr.bf16.mxu1 %v1246_v9 }
  0x3c   : > { %1103 = vmatpush3.bf16.msra.mxu0 %v1233_v52 }
  0x3d   : > { %1104 = vmatprep.subr.bf16.mxu0 %v1234_v53 }
  0x3e   : > { %1133 = vmatpush1.bf16.msra.mxu1 %v1248_v10 }
  0x3f   : > { %1135 = vmatprep.subr.bf16.mxu1 %v1249_v11 }
  0x40   : > { %1105 = vmatpush3.bf16.msra.mxu0 %v1235_v54 }
  0x41   : > { %1106 = vmatprep.subr.bf16.mxu0 %v1236_v55 }
  0x42   : > { %1137 = vmatpush1.bf16.msra.mxu1 %v1251_v12 }
  0x43   : > { %1139 = vmatprep.subr.bf16.mxu1 %v1252_v13 }
  0x44   : > { %1107 = vmatpush3.bf16.msra.mxu0 %v1237_v58 }
  0x45   : > { %1108 = vmatprep.subr.bf16.mxu0 %v1238_v60 }
  0x46   : > { %1141 = vmatpush1.bf16.msra.mxu1 %v1254_v14 }
  0x48   : > { %1109 = vmatpush3.bf16.msra.mxu0 %v1239_v1 }
  0x49   : > { %1110 = vmatprep.subr.bf16.mxu0 %v1240_v2 }
  0x4c   : > { %1111 = vmatpush3.bf16.msra.mxu0 %v1241_v3 }
  0x4f   : > { %735 = vmatmul.mubr.bf16.vlgmr.msra.gmra.mrb[4].mxu0 %v221_v6 }
 0x102   : > { %v1068_v15 = vpop.f32.mrb[0].mxu0 }
 0x103   : > { %v1090_v16 = vpop.f32.mrb[0].mxu1  ;;  %v1069_v17 = vpop.f32.mrb[1].mxu0 }
 0x104   : > { %v1070_v18 = vadd.f32 %v1069_v17, %v1068_v15  ;;  %v1091_v19 = vpop.f32.mrb[1].mxu1  ;;  %v1071_v20 = vpop.f32.mrb[2].mxu0 }
 0x105   : > { %v1092_v21 = vadd.f32 %v1091_v19, %v1090_v16  ;;  %v1093_v22 = vpop.f32.mrb[2].mxu1  ;;  %v1072_v23 = vpop.f32.mrb[3].mxu0 }
 0x106   : > { %v1073_v24 = vadd.f32 %v1072_v23, %v1071_v20  ;;  %v1094_v25 = vpop.f32.mrb[3].mxu1 }
 0x107   : > { %v696_v26 = vadd.f32 %v1092_v21, %v1070_v18  ;;  %v1095_v27 = vadd.f32 %v1094_v25, %v1093_v22 }
 0x109   : > { %v699_v28 = vadd.f32 %v1095_v27, %v1073_v24 }
 0x10b   : > { %v777_v29 = vpop.f32.mrb[4].mxu1 }
 0x10c   : > { %v1124_v30 = vpop.f32.mrb[5].mxu1 }
 0x10d   : > { %v780_v31 = vpop.f32.mrb[6].mxu1 }
 0x10e   : > { %v1125_v32 = vpop.f32.mrb[7].mxu1 }
 0x122   : > { %v1112_v33 = vpop.f32.mrb[4].mxu0 }
 0x123   : > { %v1113_v34 = vpop.f32.mrb[5].mxu0 }
 0x124   : > { %v1114_v35 = vadd.f32 %v1113_v34, %v1112_v33  ;;  %v1115_v36 = vpop.f32.mrb[6].mxu0 }
 0x125   : > { %v1116_v37 = vpop.f32.mrb[7].mxu0 }
 0x126   : > { %v737_v38 = vadd.f32 %v1114_v35, %v696_v26  ;;  %v1117_v39 = vadd.f32 %v1116_v37, %v1115_v36 }
 0x128   : > { %v778_v40 = vadd.f32 %v777_v29, %v737_v38  ;;  %v740_v41 = vadd.f32 %v1117_v39, %v699_v28 }
 0x12a   : > { %v781_v42 = vadd.f32 %v780_v31, %v740_v41  ;;  %1042 = vmatmul.mubr.msk.f32.vlgmr.msra.gmra.mrb[8].mxu1 %vm820_vm2, %v778_v40 }
 0x12b   : > { %897 = vmatprep.mubr.f32.mxu1 %v1319_v43 }
 0x12e   : > { %1043 = vmatmul.mubr.msk.f32.gmra.mrb[10].mxu1 %vm820_vm2, %v781_v42 }
 0x1fd   : > { %v893_v51 = vpop.f32.mrb[8].mxu1 }
 0x1fe   : > { %v894_v52 = vadd.f32 %v893_v51, %v813_v49  ;;  %v895_v53 = vpop.f32.mrb[9].mxu1 }
 0x1ff   : > { %v896_v43 = vadd.f32 %v895_v53, %v817_v50 }
 0x200   : > { %904 = vst [vmem:[%s193_s8] sm:$0xff] %v894_v52 }
 0x201   : > { %905 = vst [vmem:[%s193_s8 + $0x8] sm:$0xff] %v896_v43  ;;  %v899_v54 = vpop.f32.mrb[10].mxu1 }
 0x202   : > { %v900_v55 = vadd.f32 %v899_v54, %v813_v49  ;;  %v901_v56 = vpop.f32.mrb[11].mxu1 }
 0x203   : > { %v902_v57 = vadd.f32 %v901_v56, %v817_v50 }
 0x204   : > { %906 = vst [vmem:[%s193_s8 + $0x10] sm:$0xff] %v900_v55 }
 0x205   : > { %907 = vst [vmem:[%s193_s8 + $0x18] sm:$0xff] %v902_v57 }
 0x206   : > { %1268 = shalt.err (!%p1265_p3)
}
 0x207   : > { %s1269_s27 = scalar_lea.hbm %s1602_s12, 512  ;;  %s1273_s30 = scalar_lea.hbm %s1649_s4, 1024 }
 0x208   : > { %p1270_p4 = scmp.ne.s32.totalorder %s1602_s12, %s1269_s27  ;;  %p1274_p9 = scmp.lt.u32.totalorder %s1602_s12, %s1649_s4 }
 0x209   : > { %p1275_p10 = scmp.lt.u32.totalorder %s1273_s30, %s1269_s27  ;;  %p1277_p12 = scmp.lt.u32.totalorder %s1269_s27, %s1602_s12 }
 0x20a   : > { %p1271_p7 = pnand %p1270_p4, %p1387_p5 }
 0x20b   : > { %p1276_p11 = por %p1275_p10, %p1274_p9 }
 0x20c   : > { %p1272_p8 = pneg %p1271_p7 }
 0x20d   : > { %p1278_p13 = por %p1277_p12, %p1276_p11 }
 0x20f   : > { %p1279_p0 = pnand %p1278_p13, %p1272_p8 }
 0x211   : > { %1282 = shalt.err (!%p1279_p0)
}
 0x212   : > { %s1322_s7 = smov 256   ;;  %s1323_s8 = smov 16  }
 0x213   : > { %1151 = dma.vmem_to_hbm [thread:$0]  (%p1387_p5), %s1597_s9, 512, %s1602_s12, %s1604_s14, %s1322_s7, %s1322_s7, %s1323_s8  }
 0x214 PF: > { %p1157_p1 = scmp.ge.s32.totalorder %s1317_s18, 2  ;;  %s938_s10 = sand.u32 1, %s1305_s15  }
 0x215   : > { %s939_s11 = scalar_lea.sflag [#allocation3], %s938_s10 }
 0x216   : > { %p1154_p2 = pnand %p1157_p1, %p1391_p6 }
 0x218   : > { %1300 = dma.done.wait (!%p1154_p2), %s939_s11, 512  }
 0x219   : > { %1302 = vsyncadd (!%p1154_p2), %s939_s11, 4294966784  ;;  %p14_p3 = scmp.ge.s32.totalorder %s1374_s21, 4   ;;  %s1652_s15 = smov %s1309_s16 }
 0x21a   : > { %s1653_s16 = smov %s1313_s17  ;;  %s1654_s17 = smov %s1385_s24 }
 0x21b   : > { %s1655_s18 = smov %s1374_s21  ;;  %16 = sbr.rel (!%p14_p3) target bundleno = 3 (0x3), region = 71 }
 0x222   :  { %944 = vsyncpa [#allocation3], 1 }
 0x223   :  { %946 = vsyncpa [#allocation3 + $0x1], 1 }

</bundles_post_ra>
